<compile_context>
chip_gen: v6e
topology: v6e:2x2x1
jax: 0.10.0
libtpu: 0.0.40
codegen_flags: <defaults>
</compile_context>

<pallas_src>
import functools
import math

import jax
import jax.numpy as jnp
from jax.experimental import pallas as pl
from jax.experimental.pallas import tpu as pltpu


def ext_attn_kernel(x_ref, w_in_ref, b_in_ref, w_out_ref, b_out_ref, o_ref,
                    *, bt, n_valid, mm_dtype, sm_dtype):
    w_in = w_in_ref[...]            # (K, C)  mm_dtype
    b_in = b_in_ref[...]            # (K, 1)  f32
    w_out = w_out_ref[...]          # (C, K)  mm_dtype
    b_out = b_out_ref[...]          # (C, 1)  f32
    n_padded = x_ref.shape[-1]

    for i in range(bt):             # static unroll over the batch tile
        x = x_ref[i]                # (C, Np) f32 — also the residual (idn)

        # fused conv1 + linear_0:  s = (W0 @ W1c) @ x + (W0 @ b1)  -> (K, Np)
        s = jnp.dot(w_in, x.astype(mm_dtype),
                    preferred_element_type=jnp.float32) + b_in

        if n_valid != n_padded:     # lane-padding guard (static; off for N%128==0)
            lane = jax.lax.broadcasted_iota(jnp.int32, s.shape, 1)
            s = jnp.where(lane < n_valid, s, -1e30)

        # softmax over the spatial dim (lanes); elementwise chain in sm_dtype,
        # reductions and reciprocal inputs stay f32.
        m = jnp.max(s, axis=-1, keepdims=True)                          # f32
        e = jnp.exp((s - m).astype(sm_dtype))
        denom = jnp.sum(e, axis=-1, keepdims=True, dtype=jnp.float32)
        p = e * pl.reciprocal(denom, approx=True).astype(sm_dtype)      # (K, Np)

        # double-normalization scale (per spatial column, reduced over k),
        # deferred past the second matmul: W_out @ (p * c) == (W_out @ p) * c
        colsum = jnp.sum(p, axis=0, keepdims=True, dtype=jnp.float32)   # (1, Np)

        # fused linear_1 + conv2 + BN
        u = jnp.dot(w_out, p.astype(mm_dtype),
                    preferred_element_type=jnp.float32)                 # (C, Np)
        u = u * pl.reciprocal(1e-9 + colsum, approx=True) + b_out

        # residual add + ReLU
        o_ref[i] = jnp.maximum(u + x, 0.0).astype(o_ref.dtype)


def _pick_batch_tile(batch):
    """Largest Bt (<=8) dividing batch that still leaves >=2 grid steps
    (preserves v7x megacore sharding); falls back to 1."""
    if batch <= 1:
        return 1
    for bt in (8, 4, 2):
        if batch % bt == 0 and batch // bt >= 2:
            return bt
    return 1


def _compute_dtype():
    """bf16 matmul operands + bf16 softmax elementwise on v6e/v7x;
    f32 on v5e / unknown generations (no bf16 VPU/EUP there)."""
    try:
        kind = jax.devices()[0].device_kind.lower()
    except Exception:
        return jnp.float32
    if any(tag in kind for tag in ("v6", "v7", "7x")):
        return jnp.bfloat16
    return jnp.float32


def external_attention(x, w1c, b1, w0, w1, w2, bn_scale, bn_bias):
    B, C, H, W = x.shape
    N = H * W
    K = w0.shape[0]

    # pad the spatial dim to a lane-dense multiple of 128 (masked in-kernel)
    Np = ((N + 127) // 128) * 128
    xr = x.reshape(B, C, N)
    if Np != N:
        xr = jnp.pad(xr, ((0, 0), (0, 0), (0, Np - N)))

    # --- wrapper-side algebraic fusion of the purely linear stages (exact) ---
    w_in = jnp.dot(w0, w1c)                      # (K, C)
    b_in = jnp.dot(w0, b1)                       # (K, 1)
    w_out = bn_scale * jnp.dot(w2, w1)           # (C, K)  (BN scale folded)
    b_out = bn_bias                              # (C, 1)  (BN bias folded)

    mm_dtype = _compute_dtype()
    sm_dtype = mm_dtype
    w_in = w_in.astype(mm_dtype)
    w_out = w_out.astype(mm_dtype)

    bt = _pick_batch_tile(B)
    grid = (B // bt,)

    kernel = functools.partial(
        ext_attn_kernel, bt=bt, n_valid=N, mm_dtype=mm_dtype, sm_dtype=sm_dtype)

    cost = pl.CostEstimate(
        flops=int(B * (4 * K * C * Np + 8 * K * Np + 6 * C * Np)),
        transcendentals=int(B * (K * Np + K + Np)),
        bytes_accessed=int(2 * B * C * Np * 4
                           + 2 * K * C * jnp.dtype(mm_dtype).itemsize
                           + (K + 2 * C) * 4),
    )

    out = pl.pallas_call(
        kernel,
        out_shape=jax.ShapeDtypeStruct((B, C, Np), x.dtype),
        grid_spec=pltpu.PrefetchScalarGridSpec(
            num_scalar_prefetch=0,
            grid=grid,
            in_specs=[
                pl.BlockSpec((bt, C, Np), lambda b: (b, 0, 0)),  # x
                pl.BlockSpec((K, C), lambda b: (0, 0)),          # fused input weight
                pl.BlockSpec((K, 1), lambda b: (0, 0)),          # fused input bias
                pl.BlockSpec((C, K), lambda b: (0, 0)),          # fused output weight
                pl.BlockSpec((C, 1), lambda b: (0, 0)),          # fused output bias
            ],
            out_specs=pl.BlockSpec((bt, C, Np), lambda b: (b, 0, 0)),
        ),
        compiler_params=pltpu.CompilerParams(
            dimension_semantics=("parallel",),
            # small today; tile N with an "arbitrary" axis + online softmax
            # before H*W grows (esp. v7x with 64 MiB physical VMEM).
            vmem_limit_bytes=32 * 1024 * 1024,
        ),
        cost_estimate=cost,
    )(xr, w_in, b_in, w_out, b_out)

    if Np != N:
        out = out[..., :N]
    return out.reshape(B, C, H, W)


def reference(x, w1c, b1, w0, w1, w2, bn_scale, bn_bias):
    """Pure-JAX f32 reference mirroring the PyTorch forward (unfused)."""
    B, C, H, W = x.shape
    N = H * W
    xr = x.reshape(B, C, N)
    y = jnp.einsum("oc,bcn->bon", w1c, xr) + b1[None]
    s = jnp.einsum("kc,bcn->bkn", w0, y)
    p = jax.nn.softmax(s, axis=-1)
    p = p / (1e-9 + jnp.sum(p, axis=1, keepdims=True))
    z = jnp.einsum("ck,bkn->bcn", w1, p)
    u = jnp.einsum("oc,bcn->bon", w2, z)
    u = u * bn_scale[None] + bn_bias[None]
    out = jnp.maximum(u + xr, 0.0)
    return out.reshape(B, C, H, W)


if __name__ == "__main__":
    B, C, H, W = 2, 32, 16, 16
    K = 64

    key = jax.random.PRNGKey(0)
    k1, k2, k3, k4, kx = jax.random.split(key, 5)

    # conv1: Conv2d(c, c, 1) — weight ~ N(0, sqrt(2/(1*1*c))), bias keeps torch default
    w1c = jax.random.normal(k1, (C, C), jnp.float32) * math.sqrt(2.0 / C)
    bound = 1.0 / math.sqrt(C)
    b1 = jax.random.uniform(k2, (C, 1), jnp.float32, -bound, bound)

    # linear_0 / linear_1 share storage; final init is N(0, sqrt(2/(1*c)))
    # with linear_1.weight = linear_0.weight.permute(1, 0, 2)
    w0 = jax.random.normal(k3, (K, C), jnp.float32) * math.sqrt(2.0 / C)
    w1 = w0.T

    # conv2[0]: Conv2d(c, c, 1, bias=False) — weight ~ N(0, sqrt(2/c))
    w2 = jax.random.normal(k4, (C, C), jnp.float32) * math.sqrt(2.0 / C)

    # conv2[1]: BatchNorm2d(c), eval mode with default buffers, folded.
    eps = 1e-5
    gamma = jnp.ones((C, 1), jnp.float32)
    beta = jnp.zeros((C, 1), jnp.float32)
    run_mean = jnp.zeros((C, 1), jnp.float32)
    run_var = jnp.ones((C, 1), jnp.float32)
    bn_scale = gamma / jnp.sqrt(run_var + eps)
    bn_bias = beta - run_mean * bn_scale

    x = jax.random.normal(kx, (B, C, H, W), jnp.float32)

    out = external_attention(x, w1c, b1, w0, w1, w2, bn_scale, bn_bias)
    out = jax.block_until_ready(out)

    ref = reference(x, w1c, b1, w0, w1, w2, bn_scale, bn_bias)
    assert out.shape == (B, C, H, W)
    # bf16 MXU/softmax path on v6e/v7x + approx reciprocals => bf16 tolerance
    assert jnp.allclose(out, ref, atol=2e-2, rtol=2e-2), "mismatch vs reference"

    print("KERNEL_OK")
</pallas_src>

<mosaic_0001>
module attributes {stable_mosaic.version = 11 : i64} {
  func.func @ext_attn_kernel(%arg0: i32, %arg1: memref<1x32x256xf32, #tpu.memory_space<vmem>>, %arg2: memref<64x32xf32, #tpu.memory_space<vmem>>, %arg3: memref<64x1xf32, #tpu.memory_space<vmem>>, %arg4: memref<32x64xf32, #tpu.memory_space<vmem>>, %arg5: memref<32x1xf32, #tpu.memory_space<vmem>>, %arg6: memref<1x32x256xf32, #tpu.memory_space<vmem>>) attributes {dimension_semantics = [#tpu.dimension_semantics<parallel>], iteration_bounds = array<i64: 2>, scalar_prefetch = 0 : i64, scratch_operands = 0 : i64, tpu.core_type = #tpu.core_type<tc>, window_params = [{transform_indices = @transform_0, window_bounds = array<i64: 1, 32, 256>}, {pipeline_mode = #tpu.pipeline_mode<synchronous>, transform_indices = @transform_1, window_bounds = array<i64: 64, 32>}, {pipeline_mode = #tpu.pipeline_mode<synchronous>, transform_indices = @transform_2, window_bounds = array<i64: 64, 1>}, {pipeline_mode = #tpu.pipeline_mode<synchronous>, transform_indices = @transform_3, window_bounds = array<i64: 32, 64>}, {pipeline_mode = #tpu.pipeline_mode<synchronous>, transform_indices = @transform_4, window_bounds = array<i64: 32, 1>}, {transform_indices = @transform_5, window_bounds = array<i64: 1, 32, 256>}]} {
    %c0 = arith.constant 0 : index
    %c0_0 = arith.constant 0 : index
    %0 = vector.load %arg2[%c0, %c0_0] : memref<64x32xf32, #tpu.memory_space<vmem>>, vector<64x32xf32>
    %c0_1 = arith.constant 0 : index
    %c0_2 = arith.constant 0 : index
    %1 = vector.load %arg3[%c0_1, %c0_2] : memref<64x1xf32, #tpu.memory_space<vmem>>, vector<64x1xf32>
    %c0_3 = arith.constant 0 : index
    %c0_4 = arith.constant 0 : index
    %2 = vector.load %arg4[%c0_3, %c0_4] : memref<32x64xf32, #tpu.memory_space<vmem>>, vector<32x64xf32>
    %c0_5 = arith.constant 0 : index
    %c0_6 = arith.constant 0 : index
    %3 = vector.load %arg5[%c0_5, %c0_6] : memref<32x1xf32, #tpu.memory_space<vmem>>, vector<32x1xf32>
    %c0_7 = arith.constant 0 : index
    %c0_8 = arith.constant 0 : index
    %c0_9 = arith.constant 0 : index
    %4 = vector.load %arg1[%c0_7, %c0_8, %c0_9] : memref<1x32x256xf32, #tpu.memory_space<vmem>>, vector<1x32x256xf32>
    %5 = vector.shape_cast %4 : vector<1x32x256xf32> to vector<32x256xf32>
    %cst = arith.constant dense<0.000000e+00> : vector<64x256xf32>
    %6 = tpu.matmul %0, %5, %cst {dimension_numbers = #tpu.dot_dimension_numbers<[1], [0], [0], [1], [0, 0, 1, 1], [], []>} : vector<64x32xf32>, vector<32x256xf32>, vector<64x256xf32> -> vector<64x256xf32>
    %7 = vector.broadcast %1 : vector<64x1xf32> to vector<64x256xf32>
    %8 = arith.addf %6, %7 : vector<64x256xf32>
    %cst_10 = arith.constant dense<0xFF800000> : vector<64xf32>
    %9 = vector.multi_reduction <maximumf>, %8, %cst_10 [1] : vector<64x256xf32> to vector<64xf32>
    %10 = vector.shape_cast %9 : vector<64xf32> to vector<64x1xf32>
    %11 = vector.broadcast %10 : vector<64x1xf32> to vector<64x256xf32>
    %12 = arith.subf %8, %11 : vector<64x256xf32>
    %13 = math.exp %12 : vector<64x256xf32>
    %cst_11 = arith.constant dense<0.000000e+00> : vector<64xf32>
    %14 = vector.multi_reduction <add>, %13, %cst_11 [1] : vector<64x256xf32> to vector<64xf32>
    %15 = vector.shape_cast %14 : vector<64xf32> to vector<64x1xf32>
    %16 = tpu.reciprocal %15 {approx = true} : vector<64x1xf32> -> vector<64x1xf32>
    %17 = vector.broadcast %16 : vector<64x1xf32> to vector<64x256xf32>
    %18 = arith.mulf %13, %17 : vector<64x256xf32>
    %cst_12 = arith.constant dense<0.000000e+00> : vector<256xf32>
    %19 = vector.multi_reduction <add>, %18, %cst_12 [0] : vector<64x256xf32> to vector<256xf32>
    %20 = vector.shape_cast %19 : vector<256xf32> to vector<1x256xf32>
    %cst_13 = arith.constant dense<0.000000e+00> : vector<32x256xf32>
    %21 = tpu.matmul %2, %18, %cst_13 {dimension_numbers = #tpu.dot_dimension_numbers<[1], [0], [0], [1], [0, 0, 1, 1], [], []>} : vector<32x64xf32>, vector<64x256xf32>, vector<32x256xf32> -> vector<32x256xf32>
    %cst_14 = arith.constant 9.99999971E-10 : f32
    %22 = vector.broadcast %cst_14 : f32 to vector<1x256xf32>
    %23 = arith.addf %22, %20 : vector<1x256xf32>
    %24 = tpu.reciprocal %23 {approx = true} : vector<1x256xf32> -> vector<1x256xf32>
    %25 = vector.broadcast %24 : vector<1x256xf32> to vector<32x256xf32>
    %26 = arith.mulf %21, %25 : vector<32x256xf32>
    %27 = vector.broadcast %3 : vector<32x1xf32> to vector<32x256xf32>
    %28 = arith.addf %26, %27 : vector<32x256xf32>
    %29 = arith.addf %28, %5 : vector<32x256xf32>
    %cst_15 = arith.constant 0.000000e+00 : f32
    %30 = vector.broadcast %cst_15 : f32 to vector<32x256xf32>
    %31 = arith.maximumf %29, %30 : vector<32x256xf32>
    %c0_16 = arith.constant 0 : index
    %c0_17 = arith.constant 0 : index
    %c0_18 = arith.constant 0 : index
    %32 = vector.load %arg6[%c0_16, %c0_17, %c0_18] : memref<1x32x256xf32, #tpu.memory_space<vmem>>, vector<1x32x256xf32>
    %33 = vector.shape_cast %32 : vector<1x32x256xf32> to vector<32x256xf32>
    %34 = vector.shape_cast %31 : vector<32x256xf32> to vector<1x32x256xf32>
    tpu.vector_store %arg6[%c0_16, %c0_17, %c0_18], %34 {strides = array<i32>} : memref<1x32x256xf32, #tpu.memory_space<vmem>>, vector<1x32x256xf32>,
    return
  }
  func.func @transform_0(%arg0: i32) -> (i32, i32, i32) {
    %c0_i32 = arith.constant 0 : i32
    %c0_i32_0 = arith.constant 0 : i32
    %c0_i32_1 = arith.constant 0 : i32
    return %arg0, %c0_i32, %c0_i32_0 : i32, i32, i32
  }
  func.func @transform_1(%arg0: i32) -> (i32, i32) {
    %c0_i32 = arith.constant 0 : i32
    %c0_i32_0 = arith.constant 0 : i32
    %c0_i32_1 = arith.constant 0 : i32
    return %c0_i32, %c0_i32_0 : i32, i32
  }
  func.func @transform_2(%arg0: i32) -> (i32, i32) {
    %c0_i32 = arith.constant 0 : i32
    %c0_i32_0 = arith.constant 0 : i32
    %c0_i32_1 = arith.constant 0 : i32
    return %c0_i32, %c0_i32_0 : i32, i32
  }
  func.func @transform_3(%arg0: i32) -> (i32, i32) {
    %c0_i32 = arith.constant 0 : i32
    %c0_i32_0 = arith.constant 0 : i32
    %c0_i32_1 = arith.constant 0 : i32
    return %c0_i32, %c0_i32_0 : i32, i32
  }
  func.func @transform_4(%arg0: i32) -> (i32, i32) {
    %c0_i32 = arith.constant 0 : i32
    %c0_i32_0 = arith.constant 0 : i32
    %c0_i32_1 = arith.constant 0 : i32
    return %c0_i32, %c0_i32_0 : i32, i32
  }
  func.func @transform_5(%arg0: i32) -> (i32, i32, i32) {
    %c0_i32 = arith.constant 0 : i32
    %c0_i32_0 = arith.constant 0 : i32
    %c0_i32_1 = arith.constant 0 : i32
    return %arg0, %c0_i32, %c0_i32_0 : i32, i32, i32
  }
}

</mosaic_0001>

<bundles_post_ra>
// kernel: tpu_custom_call.1
= control target key start
LH: loop header
LB: loop body
LE: loop exit
PB: predicated region body
PF: predicated region fallthrough
CT: control target
= control target key end

     0   :  { %10 = vsyncpa [#allocation3], 0  ;;  %s1322_s0 = inlined_call_operand.vmem [shape: f32[2,32,256], index: 0, kind: input, shape index: {}]   ;;  %s1323_s1 = inlined_call_operand.vmem [shape: f32[64,32], index: 1, kind: input, shape index: {}]   ;;  %s1324_s2 = inlined_call_operand.vmem [shape: f32[64,1], index: 2, kind: input, shape index: {}]   ;;  %s1325_s3 = inlined_call_operand.vmem [shape: f32[32,64], index: 3, kind: input, shape index: {}]   ;;  %s1326_s4 = inlined_call_operand.vmem [shape: f32[32,1], index: 4, kind: input, shape index: {}]   ;;  %s1327_s5 = inlined_call_operand.hbm [shape: f32[2,32,256], index: 5, kind: output, shape index: {}]  }
   0x1   :  { %12 = vsyncpa [#allocation3 + $0x1], 0  ;;  %s1041_s18 = smov 0   ;;  %s1043_s19 = smov 0  }
   0x2   :  { %s1045_s20 = smov 0   ;;  %s1047_s21 = smov 0  }
   0x3 LB: > { %s1062_s22 = sadd.s32 4294967295, %s1004_s21   ;;  %s821_s23 = sadd.s32 4294967294, %s1004_s21   ;;  %s1004_s21 = sphi %s1047_s21, %s1333_s21   ;;  %s1000_s20 = sphi %s1045_s20, %s1332_s20   ;;  %s996_s19 = sphi %s1043_s19, %s1331_s19   ;;  %s992_s18 = sphi %s1041_s18, %s1330_s18  }
   0x4   : > { %s1066_s24 = sadd.s32 1, %s1004_s21   ;;  %s135_s25 = sadd.s32 1, %s1000_s20 }
   0x5   : > { %s132_s26 = ssub.s32 %s1004_s21, %s1066_s24  ;;  %p145_p0 = scmp.ne.s32.totalorder %s1000_s20, %s996_s19 }
   0x6   : > { %p133_p1 = scmp.eq.s32.totalorder %s132_s26, 0  ;;  %p146_p2 = scmp.eq.s32.totalorder %s1062_s22, 1 }
   0x7   : > { %p151_p3 = scmp.ne.s32.totalorder %s996_s19, %s992_s18  ;;  %p152_p4 = scmp.eq.s32.totalorder %s821_s23, 1 }
   0x8   : > { %s1077_s27 = scalar_select %p133_p1, %s1000_s20, %s135_s25  }
   0x9   : > { %p1079_p5 = por %p146_p2, %p145_p0  ;;  %p1083_p6 = por %p152_p4, %p151_p3 }
   0xa   : > { %p824_p7 = scmp.ge.s32.totalorder %s1004_s21, 1  ;;  %p190_p8 = scmp.lt.s32.totalorder %s1004_s21, 3 }
   0xc   : > { %p191_p9 = pnand %p824_p7, %p190_p8 }
   0xd   : > { %p218_p10 = scmp.lt.s32.totalorder (!%p191_p9), %s1062_s22, 1  ;;  %s846_s13 = sshll.u32 (!%p191_p9), %s1062_s22, 10 }
   0xe   : > { %194 = sbr.rel (%p191_p9) target bundleno = 821 (0x335), region = 40  ;;  %s1274_s17 = scalar_lea.hbm (!%p191_p9), %s1327_s5, %s846_s13 }
   0xf   : > { %s1008_s25 = smov (!%p191_p9), [#allocation2]  }
  0x10   : > { %s948_s26 = sshll.u32 (!%p191_p9), %s1008_s25, 4  ;;  %s949_s26 = int_to_ptr.vmem [resolvable:$false] %s948_s26 }
  0x13   : > { %v1006_v0 = vmov 0.0   ;;  %s219_s30 = scalar_select %p218_p10, %s1062_s22, 1  ;;  %v1007_v1 = vmov 0   ;;  %v236_v2 = vld [vmem:[%s1324_s2 + $0x28] sm:$0xff]  ;;  %v238_v3 = vld [vmem:[%s1324_s2 + $0x38] sm:$0xff]  ;;  %v235_v4 = vld [vmem:[%s1324_s2 + $0x20] sm:$0xff] }
  0x14   : > { %384 = vmatprep.mubr.f32.mxu0 %v1006_v0  ;;  %656 = vmatprep.mubr.f32.mxu1 %v1006_v0  ;;  %v237_v5 = vld [vmem:[%s1324_s2 + $0x30] sm:$0xff]  ;;  %v234_v13 = vld [vmem:[%s1324_s2 + $0x18] sm:$0xff]  ;;  %v223_v16 = vld [vmem:[%s1323_s1] sm:$0xff]  ;;  %vm295_vm0 = vcmask 261120   ;;  %vm579_vm1 = vcmask 523264  }
  0x15   : > { %891 = vset.pattern.permute.xlu1 %v1007_v1  ;;  %890 = vset.pattern.permute.xlu0 %v1007_v1  ;;  %s845_s10 = sshll.u32 %s219_s30, 6  ;;  %v233_v11 = vld [vmem:[%s1324_s2 + $0x10] sm:$0xff]  ;;  %v231_v17 = vld [vmem:[%s1324_s2] sm:$0xff]  ;;  %v232_v18 = vld [vmem:[%s1324_s2 + $0x8] sm:$0xff]  ;;  %s950_s30 = scalar_lea.vmem %s949_s26, 2048 }
  0x16   : > { %282 = vperm.xlu1 %891, %v236_v2   ;;  %292 = vperm.xlu0 %890, %v238_v3   ;;  %s222_s15 = scalar_lea.vmem %s1322_s0, %s845_s10  ;;  %v224_v19 = vld [vmem:[%s1323_s1 + $0x8] sm:$0xff]  ;;  %v225_v20 = vld [vmem:[%s1323_s1 + $0x10] sm:$0xff]  ;;  %v226_v21 = vld [vmem:[%s1323_s1 + $0x18] sm:$0xff]  ;;  %s215_s10 = sand.u32 1, %s996_s19  }
  0x17   : > { %v1108_v6 = vld [vmem:[%s222_s15 + $0x38] sm:$0xff]  ;;  %v1110_v7 = vld [vmem:[%s222_s15 + $0x30] sm:$0xff]  ;;  %v1112_v8 = vld [vmem:[%s222_s15 + $0x28] sm:$0xff]  ;;  %s825_s11 = sshll.u32 %s215_s10, 6  ;;  %s1282_s22 = scalar_lea.sflag [#allocation3], %s215_s10 }
  0x18   : > { %344 = vmatprep.subr.mxu0 %v1108_v6  ;;  %v1115_v9 = vld [vmem:[%s222_s15 + $0x20] sm:$0xff]  ;;  %v1118_v10 = vld [vmem:[%s222_s15 + $0x18] sm:$0xff]  ;;  %v1124_v12 = vld [vmem:[%s222_s15 + $0x10] sm:$0xff]  ;;  %s1255_s12 = scalar_lea.vmem [#allocation2], %s825_s11 }
  0x19   : > { %345 = vmatpush1.msra.mxu0 %v1110_v7  ;;  %v1130_v14 = vld [vmem:[%s222_s15 + $0x8] sm:$0xff]  ;;  %v1133_v15 = vld [vmem:[%s222_s15] sm:$0xff]  ;;  %v229_v24 = vld [vmem:[%s1323_s1 + $0x30] sm:$0xff]  ;;  %s759_s14 = sshll.u32 %s1255_s12, 4  ;;  %s1276_s14 = int_to_ptr.vmem [resolvable:$true] %s759_s14 }
  0x1a   : > { %277 = vperm.xlu1 %891, %v235_v4   ;;  %287 = vperm.xlu0 %890, %v237_v5   ;;  %v227_v22 = vld [vmem:[%s1323_s1 + $0x20] sm:$0xff]  ;;  %v228_v23 = vld [vmem:[%s1323_s1 + $0x28] sm:$0xff]  ;;  %v230_v25 = vld [vmem:[%s1323_s1 + $0x38] sm:$0xff]  ;;  %s944_s23 = scalar_lea.vmem %s1276_s14, 1024  ;;  %p951_p0 = scmp.lt.s32.totalorder %s1276_s14, %s949_s26 }
  0x1b   : > { %346 = vmatprep.subr.mxu0 %v1112_v8  ;;  %p945_p11 = scmp.ne.s32.totalorder %s1276_s14, %s944_s23  ;;  %p952_p1 = scmp.lt.s32.totalorder %s950_s30, %s944_s23 }
  0x1c   : > { %347 = vmatpush1.msra.mxu0 %v1115_v9 }
  0x1d   : > { %348 = vmatprep.subr.mxu0 %v1118_v10  ;;  %p946_p12 = pnand %p945_p11, %p1079_p5  ;;  %p953_p2 = por %p952_p1, %p951_p0 }
  0x1e   : > { %267 = vperm.xlu1 %891, %v233_v11   ;;  %349 = vmatpush1.msra.mxu0 %v1124_v12 }
  0x1f   : > { %272 = vperm.xlu0 %890, %v234_v13   ;;  %350 = vmatprep.subr.mxu0 %v1130_v14  ;;  %p947_p13 = pneg %p946_p12 }
  0x20   : > { %351 = vmatpush1.msra.mxu0 %v1133_v15 }
  0x21   : > { %828 = vmatmul.mubr.msk.f32.vlgmr.msra.gmra.mxu0 %vm295_vm0, %v223_v16  ;;  %p954_p3 = pnand %p953_p2, %p947_p13 }
  0x22   : > { %257 = vperm.xlu1 %891, %v231_v17   ;;  %390 = vmatprep.mubr.f32.mxu0 %v1006_v0 }
  0x23   : > { %262 = vperm.xlu0 %890, %v232_v18  }
  0x25   : > { %829 = vmatmul.mubr.msk.f32.gmra.mxu0 %vm295_vm0, %v224_v19 }
  0x26   : > { %396 = vmatprep.mubr.f32.mxu0 %v1006_v0 }
  0x29   : > { %830 = vmatmul.mubr.msk.f32.gmra.mxu0 %vm295_vm0, %v225_v20 }
  0x2a   : > { %402 = vmatprep.mubr.f32.mxu0 %v1006_v0 }
  0x2d   : > { %831 = vmatmul.mubr.msk.f32.gmra.mxu0 %vm295_vm0, %v226_v21 }
  0x2e   : > { %408 = vmatprep.mubr.f32.mxu0 %v1006_v0 }
  0x31   : > { %832 = vmatmul.mubr.msk.f32.gmra.mxu0 %vm295_vm0, %v227_v22 }
  0x32   : > { %414 = vmatprep.mubr.f32.mxu0 %v1006_v0 }
  0x35   : > { %833 = vmatmul.mubr.msk.f32.gmra.mxu0 %vm295_vm0, %v228_v23 }
  0x36   : > { %420 = vmatprep.mubr.f32.mxu0 %v1006_v0 }
  0x39   : > { %834 = vmatmul.mubr.msk.f32.gmra.mxu0 %vm295_vm0, %v229_v24 }
  0x3a   : > { %426 = vmatprep.mubr.f32.mxu0 %v1006_v0 }
  0x3d   : > { %835 = vmatmul.mubr.msk.f32.gmra.mxu0 %vm295_vm0, %v230_v25 }
  0x91   : > { %v293_v33 = vpop.permute.xlu0 %292  ;;  %v283_v41 = vpop.permute.xlu1 %282 }
  0x95   : > { %v288_v37 = vpop.permute.xlu0 %287  ;;  %v278_v53 = vpop.permute.xlu1 %277 }
  0x99   : > { %v268_v1 = vpop.permute.xlu1 %267 }
  0x9a   : > { %v273_v42 = vpop.permute.xlu0 %272 }
  0x9d   : > { %v258_v11 = vpop.permute.xlu1 %257 }
  0x9e   : > { %v263_v54 = vpop.permute.xlu0 %262 }
  0xe1   : > { %v386_v26 = vpop.f32.mrf.mxu0 }
  0xe2   : > { %v387_v17 = vadd.f32 %v386_v26, %v258_v11 }
  0xe3   : > { %v388_v27 = vpop.f32.mrf.mxu0 }
  0xe4   : > { %v1186_v13 = vadd.f32 %v388_v27, %v258_v11 }
  0xe5   : > { %v392_v28 = vpop.f32.mrf.mxu0 }
  0xe6   : > { %v393_v59 = vadd.f32 %v392_v28, %v263_v54  ;;  %v433_v18 = vmax.f32 %v387_v17, %v1186_v13 }
  0xe7   : > { %v394_v29 = vpop.f32.mrf.mxu0 }
  0xe8   : > { %v1183_v55 = vadd.f32 %v394_v29, %v263_v54 }
  0xe9   : > { %v398_v30 = vpop.f32.mrf.mxu0 }
  0xea   : > { %v436_v63 = vmax.f32 %v393_v59, %v1183_v55  ;;  %v399_v5 = vadd.f32 %v398_v30, %v268_v1 }
  0xeb   : > { %v400_v31 = vpop.f32.mrf.mxu0 }
  0xec   : > { %v401_v3 = vadd.f32 %v400_v31, %v268_v1 }
  0xed   : > { %v404_v32 = vpop.f32.mrf.mxu0 }
  0xee   : > { %v405_v50 = vadd.f32 %v404_v32, %v273_v42  ;;  %v439_v16 = vmax.f32 %v399_v5, %v401_v3 }
  0xef   : > { %v406_v34 = vpop.f32.mrf.mxu0 }
  0xf0   : > { %v407_v47 = vadd.f32 %v406_v34, %v273_v42 }
  0xf1   : > { %v410_v35 = vpop.f32.mrf.mxu0 }
  0xf2   : > { %v442_v58 = vmax.f32 %v405_v50, %v407_v47  ;;  %v411_v2 = vadd.f32 %v410_v35, %v278_v53 }
  0xf3   : > { %v412_v36 = vpop.f32.mrf.mxu0 }
  0xf4   : > { %v413_v61 = vadd.f32 %v412_v36, %v278_v53 }
  0xf5   : > { %v416_v38 = vpop.f32.mrf.mxu0 }
  0xf6   : > { %v417_v60 = vadd.f32 %v416_v38, %v283_v41  ;;  %v445_v4 = vmax.f32 %v411_v2, %v413_v61 }
  0xf7   : > { %v418_v39 = vpop.f32.mrf.mxu0 }
  0xf8   : > { %v419_v56 = vadd.f32 %v418_v39, %v283_v41 }
  0xf9   : > { %v422_v40 = vpop.f32.mrf.mxu0 }
  0xfa   : > { %v423_v44 = vadd.f32 %v422_v40, %v288_v37  ;;  %v448_v62 = vmax.f32 %v417_v60, %v419_v56 }
  0xfb   : > { %v424_v43 = vpop.f32.mrf.mxu0 }
  0xfc   : > { %v425_v45 = vadd.f32 %v424_v43, %v288_v37 }
  0xfd   : > { %v428_v46 = vpop.f32.mrf.mxu0 }
  0xfe   : > { %v451_v48 = vmax.f32 %v423_v44, %v425_v45  ;;  %v429_v51 = vadd.f32 %v428_v46, %v293_v33 }
  0xff   : > { %v430_v49 = vpop.f32.mrf.mxu0 }
 0x100   : > { %v431_v52 = vadd.f32 %v430_v49, %v293_v33  ;;  %452 = vmax.xlane.f32.xlu1 %v451_v48 }
 0x102   : > { %v454_v57 = vmax.f32 %v429_v51, %v431_v52 }
 0x104   : > { %455 = vmax.xlane.f32.xlu0 %v454_v57  ;;  %443 = vmax.xlane.f32.xlu1 %v442_v58 }
 0x108   : > { %449 = vmax.xlane.f32.xlu0 %v448_v62  ;;  %437 = vmax.xlane.f32.xlu1 %v436_v63 }
 0x10c   : > { %446 = vmax.xlane.f32.xlu0 %v445_v4 }
 0x110   : > { %440 = vmax.xlane.f32.xlu0 %v439_v16 }
 0x114   : > { %434 = vmax.xlane.f32.xlu0 %v433_v18 }
 0x189   : > { %v453_v19 = vpop.xlane.xlu1 %452 }
 0x18a   : > { %v469_v20 = vsub.f32 %v423_v44, %v453_v19  ;;  %v470_v21 = vsub.f32 %v425_v45, %v453_v19 }
 0x18c   : > { %v497_v22 = vmul.f32 1.442695, %v469_v20  ;;  %v499_v23 = vmul.f32 1.442695, %v470_v21 }
 0x18d   : > { %v456_v24 = vpop.xlane.xlu0 %455  ;;  %v444_v25 = vpop.xlane.xlu1 %443 }
 0x18e   : > { %892 = vpow2.f32 %v497_v22  ;;  %v471_v28 = vsub.f32 %v429_v51, %v456_v24  ;;  %v472_v29 = vsub.f32 %v431_v52, %v456_v24  ;;  %v463_v31 = vsub.f32 %v405_v50, %v444_v25 }
 0x18f   : > { %894 = vpow2.f32 %v499_v23  ;;  %v464_v32 = vsub.f32 %v407_v47, %v444_v25 }
 0x190   : > { %v501_v30 = vmul.f32 1.442695, %v471_v28  ;;  %v503_v27 = vmul.f32 1.442695, %v472_v29  ;;  %v485_v36 = vmul.f32 1.442695, %v463_v31 }
 0x191   : > { %v450_v26 = vpop.xlane.xlu0 %449  ;;  %v438_v33 = vpop.xlane.xlu1 %437  ;;  %v487_v40 = vmul.f32 1.442695, %v464_v32  ;;  %v246_v31 = vld [vmem:[%s1326_s4 + $0x18] sm:$0xff]  ;;  %v244_v32 = vld [vmem:[%s1326_s4 + $0x8] sm:$0xff] }
 0x192   : > { %896 = vpow2.f32 %v501_v30  ;;  %v467_v34 = vsub.f32 %v417_v60, %v450_v26  ;;  %v468_v35 = vsub.f32 %v419_v56, %v450_v26  ;;  %v459_v39 = vsub.f32 %v393_v59, %v438_v33  ;;  %v243_v30 = vld [vmem:[%s1326_s4] sm:$0xff] }
 0x193   : > { %898 = vpow2.f32 %v503_v27  ;;  %v460_v41 = vsub.f32 %v1183_v55, %v438_v33  ;;  %v245_v27 = vld [vmem:[%s1326_s4 + $0x10] sm:$0xff] }
 0x194   : > { %v493_v37 = vmul.f32 1.442695, %v467_v34  ;;  %v495_v38 = vmul.f32 1.442695, %v468_v35  ;;  %v477_v45 = vmul.f32 1.442695, %v459_v39 }
 0x195   : > { %v447_v42 = vpop.xlane.xlu0 %446  ;;  %v479_v48 = vmul.f32 1.442695, %v460_v41 }
 0x196   : > { %900 = vpow2.f32 %v493_v37  ;;  %v465_v43 = vsub.f32 %v411_v2, %v447_v42  ;;  %v466_v44 = vsub.f32 %v413_v61, %v447_v42 }
 0x197   : > { %902 = vpow2.f32 %v495_v38 }
 0x198   : > { %904 = vpow2.f32 %v485_v36  ;;  %v489_v46 = vmul.f32 1.442695, %v465_v43  ;;  %v491_v47 = vmul.f32 1.442695, %v466_v44 }
 0x199   : > { %906 = vpow2.f32 %v487_v40  ;;  %v441_v49 = vpop.xlane.xlu0 %440 }
 0x19a   : > { %908 = vpow2.f32 %v489_v46  ;;  %v461_v50 = vsub.f32 %v399_v5, %v441_v49  ;;  %v462_v51 = vsub.f32 %v401_v3, %v441_v49 }
 0x19b   : > { %v1190_v52 = vpop.eup %892  ;;  %910 = vpow2.f32 %v491_v47 }
 0x19c   : > { %v1192_v53 = vpop.eup %894  ;;  %912 = vpow2.f32 %v477_v45  ;;  %v481_v54 = vmul.f32 1.442695, %v461_v50  ;;  %v483_v55 = vmul.f32 1.442695, %v462_v51 }
 0x19d   : > { %914 = vpow2.f32 %v479_v48  ;;  %v435_v56 = vpop.xlane.xlu0 %434  ;;  %v523_v57 = vadd.f32 %v1192_v53, %v1190_v52 }
 0x19e   : > { %916 = vpow2.f32 %v481_v54  ;;  %v457_v58 = vsub.f32 %v387_v17, %v435_v56  ;;  %v458_v59 = vsub.f32 %v1186_v13, %v435_v56 }
 0x19f   : > { %v897_v60 = vpop.eup %896  ;;  %918 = vpow2.f32 %v483_v55  ;;  %524 = vadd.xlane.f32.xlu0 %v523_v57 }
 0x1a0   : > { %v899_v61 = vpop.eup %898  ;;  %v473_v62 = vmul.f32 1.442695, %v457_v58  ;;  %v475_v63 = vmul.f32 1.442695, %v458_v59 }
 0x1a1   : > { %v526_v1 = vadd.f32 %v899_v61, %v897_v60 }
 0x1a2   : > { %920 = vpow2.f32 %v473_v62 }
 0x1a3   : > { %v901_v2 = vpop.eup %900  ;;  %922 = vpow2.f32 %v475_v63  ;;  %527 = vadd.xlane.f32.xlu1 %v526_v1 }
 0x1a4   : > { %v903_v3 = vpop.eup %902 }
 0x1a5   : > { %v1197_v4 = vpop.eup %904  ;;  %v520_v5 = vadd.f32 %v903_v3, %v901_v2 }
 0x1a6   : > { %v1199_v11 = vpop.eup %906 }
 0x1a7   : > { %v909_v16 = vpop.eup %908  ;;  %521 = vadd.xlane.f32.xlu1 %v520_v5  ;;  %v514_v18 = vadd.f32 %v1199_v11, %v1197_v4 }
 0x1a8   : > { %v911_v13 = vpop.eup %910 }
 0x1a9   : > { %v1201_v17 = vpop.eup %912  ;;  %v517_v19 = vadd.f32 %v911_v13, %v909_v16 }
 0x1aa   : > { %v1205_v20 = vpop.eup %914 }
 0x1ab   : > { %v917_v21 = vpop.eup %916  ;;  %515 = vadd.xlane.f32.xlu1 %v514_v18  ;;  %518 = vadd.xlane.f32.xlu0 %v517_v19  ;;  %v508_v23 = vadd.f32 %v1205_v20, %v1201_v17 }
 0x1ac   : > { %v919_v22 = vpop.eup %918 }
 0x1ad   : > { %v511_v24 = vadd.f32 %v919_v22, %v917_v21 }
 0x1af   : > { %v1209_v25 = vpop.eup %920  ;;  %509 = vadd.xlane.f32.xlu1 %v508_v23  ;;  %512 = vadd.xlane.f32.xlu0 %v511_v24 }
 0x1b0   : > { %v923_v28 = vpop.eup %922 }
 0x1b1   : > { %v505_v29 = vadd.f32 %v923_v28, %v1209_v25 }
 0x1b3   : > { %506 = vadd.xlane.f32.xlu0 %v505_v29 }
 0x1c0   : > { %695 = vperm.xlu1 %891, %v243_v30  }
 0x1c4   : > { %705 = vperm.xlu1 %891, %v245_v27  }
 0x1c8   : > { %710 = vperm.xlu1 %891, %v246_v31  }
 0x1c9   : > { %700 = vperm.xlu0 %890, %v244_v32  }
 0x228   : > { %v525_v26 = vpop.xlane.xlu0 %524 }
 0x229   : > { %924 = vrcp.f32 %v525_v26 }
 0x22c   : > { %v528_v33 = vpop.xlane.xlu1 %527 }
 0x22d   : > { %926 = vrcp.f32 %v528_v33 }
 0x230   : > { %v522_v34 = vpop.xlane.xlu1 %521 }
 0x231   : > { %928 = vrcp.f32 %v522_v34 }
 0x234   : > { %v516_v35 = vpop.xlane.xlu1 %515  ;;  %v519_v36 = vpop.xlane.xlu0 %518 }
 0x235   : > { %930 = vrcp.f32 %v516_v35 }
 0x236   : > { %932 = vrcp.f32 %v519_v36  ;;  %v925_v39 = vpop.eup %924 }
 0x237   : > { %v550_v44 = vmul.f32 %v925_v39, %v1192_v53  ;;  %v549_v46 = vmul.f32 %v925_v39, %v1190_v52 }
 0x238   : > { %v510_v37 = vpop.xlane.xlu1 %509  ;;  %v513_v38 = vpop.xlane.xlu0 %512 }
 0x239   : > { %934 = vrcp.f32 %v510_v37 }
 0x23a   : > { %v927_v40 = vpop.eup %926  ;;  %936 = vrcp.f32 %v513_v38 }
 0x23b   : > { %v552_v41 = vmul.f32 %v927_v40, %v899_v61  ;;  %v551_v42 = vmul.f32 %v927_v40, %v897_v60 }
 0x23c   : > { %v507_v43 = vpop.xlane.xlu0 %506 }
 0x23d   : > { %938 = vrcp.f32 %v507_v43  ;;  %608 = vmatprep.subr.mxu1 %v552_v41 }
 0x23e   : > { %v929_v45 = vpop.eup %928  ;;  %609 = vmatpush1.msra.mxu1 %v551_v42 }
 0x23f   : > { %v548_v47 = vmul.f32 %v929_v45, %v903_v3  ;;  %v547_v48 = vmul.f32 %v929_v45, %v901_v2  ;;  %610 = vmatprep.subr.mxu1 %v550_v44  ;;  %v239_v3 = vld [vmem:[%s1325_s3] sm:$0xff] }
 0x240   : > { %611 = vmatpush1.msra.mxu1 %v549_v46 }
 0x241   : > { %612 = vmatprep.subr.mxu1 %v548_v47 }
 0x242   : > { %v931_v49 = vpop.eup %930  ;;  %613 = vmatpush1.msra.mxu1 %v547_v48 }
 0x243   : > { %v933_v50 = vpop.eup %932  ;;  %v544_v56 = vmul.f32 %v931_v49, %v1199_v11  ;;  %v543_v57 = vmul.f32 %v931_v49, %v1197_v4 }
 0x244   : > { %v546_v51 = vmul.f32 %v933_v50, %v911_v13  ;;  %v545_v54 = vmul.f32 %v933_v50, %v909_v16  ;;  %v240_v13 = vld [vmem:[%s1325_s3 + $0x8] sm:$0xff] }
 0x246   : > { %v935_v55 = vpop.eup %934  ;;  %614 = vmatprep.subr.mxu1 %v546_v51 }
 0x247   : > { %v937_v53 = vpop.eup %936  ;;  %615 = vmatpush1.msra.mxu1 %v545_v54  ;;  %v540_v60 = vmul.f32 %v935_v55, %v1205_v20  ;;  %v539_v61 = vmul.f32 %v935_v55, %v1201_v17 }
 0x248   : > { %v541_v52 = vmul.f32 %v937_v53, %v917_v21  ;;  %v542_v58 = vmul.f32 %v937_v53, %v919_v22  ;;  %616 = vmatprep.subr.mxu1 %v544_v56  ;;  %v241_v21 = vld [vmem:[%s1325_s3 + $0x10] sm:$0xff] }
 0x249   : > { %617 = vmatpush1.msra.mxu1 %v543_v57 }
 0x24a   : > { %v939_v59 = vpop.eup %938  ;;  %618 = vmatprep.subr.mxu1 %v542_v58 }
 0x24b   : > { %v537_v62 = vmul.f32 %v939_v59, %v1209_v25  ;;  %v538_v63 = vmul.f32 %v939_v59, %v923_v28  ;;  %619 = vmatpush1.msra.mxu1 %v541_v52  ;;  %v242_v28 = vld [vmem:[%s1325_s3 + $0x18] sm:$0xff] }
 0x24c   : > { %620 = vmatprep.subr.mxu1 %v540_v60 }
 0x24d   : > { %v566_v1 = vadd.f32 %v540_v60, %v538_v63  ;;  %v553_v2 = vadd.f32 %v539_v61, %v537_v62  ;;  %621 = vmatpush1.msra.mxu1 %v539_v61 }
 0x24e   : > { %622 = vmatprep.subr.mxu1 %v538_v63 }
 0x24f   : > { %v567_v4 = vadd.f32 %v566_v1, %v542_v58  ;;  %v554_v5 = vadd.f32 %v553_v2, %v541_v52  ;;  %623 = vmatpush1.msra.mxu1 %v537_v62 }
 0x250   : > { %836 = vmatmul.mubr.msk.f32.vlgmr.msra.gmra.mxu1 %vm579_vm1, %v239_v3 }
 0x251   : > { %v568_v11 = vadd.f32 %v567_v4, %v544_v56  ;;  %v555_v16 = vadd.f32 %v554_v5, %v543_v57  ;;  %662 = vmatprep.mubr.f32.mxu1 %v1006_v0 }
 0x253   : > { %v569_v17 = vadd.f32 %v568_v11, %v546_v51  ;;  %v556_v18 = vadd.f32 %v555_v16, %v545_v54  ;;  %v701_v54 = vpop.permute.xlu0 %700 }
 0x254   : > { %837 = vmatmul.mubr.msk.f32.gmra.mxu1 %vm579_vm1, %v240_v13 }
 0x255   : > { %v570_v19 = vadd.f32 %v569_v17, %v548_v47  ;;  %v557_v20 = vadd.f32 %v556_v18, %v547_v48  ;;  %668 = vmatprep.mubr.f32.mxu1 %v1006_v0 }
 0x257   : > { %v571_v22 = vadd.f32 %v570_v19, %v550_v44  ;;  %v558_v23 = vadd.f32 %v557_v20, %v549_v46  ;;  %v696_v44 = vpop.permute.xlu1 %695 }
 0x258   : > { %838 = vmatmul.mubr.msk.f32.gmra.mxu1 %vm579_vm1, %v241_v21 }
 0x259   : > { %v572_v24 = vadd.f32 %v571_v22, %v552_v41  ;;  %v559_v25 = vadd.f32 %v558_v23, %v551_v42  ;;  %674 = vmatprep.mubr.f32.mxu1 %v1006_v0 }
 0x25b   : > { %v560_v29 = vrot.slane %v559_v25, 4  ;;  %v573_v30 = vrot.slane %v572_v24, 4  ;;  %v706_v58 = vpop.permute.xlu1 %705 }
 0x25c   : > { %839 = vmatmul.mubr.msk.f32.gmra.mxu1 %vm579_vm1, %v242_v28 }
 0x25d   : > { %v561_v27 = vadd.f32 %v560_v29, %v559_v25  ;;  %v574_v31 = vadd.f32 %v573_v30, %v572_v24 }
 0x25f   : > { %v562_v32 = vrot.slane %v561_v27, 2  ;;  %v575_v26 = vrot.slane %v574_v31, 2  ;;  %v711_v13 = vpop.permute.xlu1 %710 }
 0x261   : > { %v563_v33 = vadd.f32 %v562_v32, %v561_v27  ;;  %v576_v34 = vadd.f32 %v575_v26, %v574_v31 }
 0x263   : > { %v564_v35 = vrot.slane %v563_v33, 1  ;;  %v577_v36 = vrot.slane %v576_v34, 1 }
 0x265   : > { %v565_v37 = vadd.f32 %v564_v35, %v563_v33  ;;  %v578_v0 = vadd.f32 %v577_v36, %v576_v34 }
 0x267   : > { %v681_v38 = vadd.f32 1e-09, %v565_v37  ;;  %v682_v39 = vadd.f32 1e-09, %v578_v0 }
 0x269   : > { %940 = vrcp.f32 %v681_v38 }
 0x26a   : > { %942 = vrcp.f32 %v682_v39 }
 0x276   : > { %v941_v40 = vpop.eup %940 }
 0x277   : > { %v943_v43 = vpop.eup %942 }
 0x310   : > { %v658_v41 = vpop.f32.mrf.mxu1 }
 0x311   : > { %v685_v42 = vmul.f32 %v941_v40, %v658_v41 }
 0x312   : > { %v660_v45 = vpop.f32.mrf.mxu1 }
 0x313   : > { %v713_v46 = vadd.f32 %v696_v44, %v685_v42  ;;  %v686_v47 = vmul.f32 %v943_v43, %v660_v45 }
 0x314   : > { %v664_v48 = vpop.f32.mrf.mxu1 }
 0x315   : > { %v721_v49 = vadd.f32 %v713_v46, %v1133_v15  ;;  %v714_v50 = vadd.f32 %v696_v44, %v686_v47  ;;  %v687_v51 = vmul.f32 %v941_v40, %v664_v48 }
 0x316   : > { %v666_v55 = vpop.f32.mrf.mxu1 }
 0x317   : > { %v729_v56 = vmax.f32 %v721_v49, 0.0  ;;  %v722_v53 = vadd.f32 %v714_v50, %v1130_v14  ;;  %v715_v57 = vadd.f32 %v701_v54, %v687_v51  ;;  %v688_v52 = vmul.f32 %v943_v43, %v666_v55 }
 0x318   : > { %v670_v59 = vpop.f32.mrf.mxu1 }
 0x319   : > { %737 = vst [vmem:[%s1255_s12] sm:$0xff] %v729_v56  ;;  %v730_v60 = vmax.f32 %v722_v53, 0.0  ;;  %v723_v15 = vadd.f32 %v715_v57, %v1124_v12  ;;  %v716_v61 = vadd.f32 %v701_v54, %v688_v52  ;;  %v689_v62 = vmul.f32 %v941_v40, %v670_v59 }
 0x31a   : > { %v672_v63 = vpop.f32.mrf.mxu1 }
 0x31b   : > { %738 = vst [vmem:[%s1255_s12 + $0x8] sm:$0xff] %v730_v60  ;;  %v731_v1 = vmax.f32 %v723_v15, 0.0  ;;  %v724_v14 = vadd.f32 %v716_v61, %v1118_v10  ;;  %v717_v2 = vadd.f32 %v706_v58, %v689_v62  ;;  %v690_v3 = vmul.f32 %v943_v43, %v672_v63 }
 0x31c   : > { %v676_v4 = vpop.f32.mrf.mxu1 }
 0x31d   : > { %739 = vst [vmem:[%s1255_s12 + $0x10] sm:$0xff] %v731_v1  ;;  %v732_v5 = vmax.f32 %v724_v14, 0.0  ;;  %v725_v11 = vadd.f32 %v717_v2, %v1115_v9  ;;  %v718_v12 = vadd.f32 %v706_v58, %v690_v3  ;;  %v691_v16 = vmul.f32 %v941_v40, %v676_v4 }
 0x31e   : > { %v678_v17 = vpop.f32.mrf.mxu1 }
 0x31f   : > { %740 = vst [vmem:[%s1255_s12 + $0x18] sm:$0xff] %v732_v5  ;;  %v733_v18 = vmax.f32 %v725_v11, 0.0  ;;  %v726_v10 = vadd.f32 %v718_v12, %v1112_v8  ;;  %v719_v19 = vadd.f32 %v711_v13, %v691_v16  ;;  %v692_v20 = vmul.f32 %v943_v43, %v678_v17 }
 0x321   : > { %741 = vst [vmem:[%s1255_s12 + $0x20] sm:$0xff] %v733_v18  ;;  %v734_v21 = vmax.f32 %v726_v10, 0.0  ;;  %v727_v22 = vadd.f32 %v719_v19, %v1110_v7  ;;  %v720_v9 = vadd.f32 %v711_v13, %v692_v20 }
 0x323   : > { %742 = vst [vmem:[%s1255_s12 + $0x28] sm:$0xff] %v734_v21  ;;  %v735_v23 = vmax.f32 %v727_v22, 0.0  ;;  %v728_v24 = vadd.f32 %v720_v9, %v1108_v6 }
 0x325   : > { %743 = vst [vmem:[%s1255_s12 + $0x30] sm:$0xff] %v735_v23  ;;  %v736_v8 = vmax.f32 %v728_v24, 0.0 }
 0x327   : > { %744 = vst [vmem:[%s1255_s12 + $0x38] sm:$0xff] %v736_v8 }
 0x328   : > { %957 = shalt.err (!%p954_p3)
}
 0x329   : > { %s958_s6 = scalar_lea.hbm %s1274_s17, 1024  ;;  %s962_s9 = scalar_lea.hbm %s1327_s5, 2048 }
 0x32a   : > { %p959_p4 = scmp.ne.s32.totalorder %s1274_s17, %s958_s6  ;;  %p963_p9 = scmp.lt.s32.totalorder %s1274_s17, %s1327_s5 }
 0x32b   : > { %p964_p10 = scmp.lt.s32.totalorder %s962_s9, %s958_s6 }
 0x32c   : > { %p960_p7 = pnand %p959_p4, %p1079_p5 }
 0x32d   : > { %p965_p11 = por %p964_p10, %p963_p9 }
 0x32e   : > { %p961_p8 = pneg %p960_p7 }
 0x330   : > { %p966_p12 = pnand %p965_p11, %p961_p8 }
 0x332   : > { %969 = shalt.err (!%p966_p12)
}
 0x333   : > { %s1009_s12 = smov 256   ;;  %s1010_s13 = smov 16  }
 0x334   : > { %847 = dma.vmem_to_hbm [thread:$0]  (%p1079_p5), %s1276_s14, 1024, %s1274_s17, %s1282_s22, %s1009_s12, %s1009_s12, %s1010_s13  }
 0x335 PF: > { %p853_p13 = scmp.ge.s32.totalorder %s1004_s21, 2  ;;  %s774_s15 = sand.u32 1, %s992_s18  }
 0x336   : > { %s775_s16 = scalar_lea.sflag [#allocation3], %s774_s15 }
 0x337   : > { %p850_p0 = pnand %p853_p13, %p1083_p6 }
 0x339   : > { %p851_p1 = pneg %p850_p0 }
 0x33b   : > { %987 = dma.done.wait (%p851_p1), %s775_s16, 1024  }
 0x33c   : > { %989 = vsyncadd (%p851_p1), %s775_s16, 4294966272  ;;  %p15_p2 = scmp.ge.s32.totalorder %s1066_s24, 4   ;;  %s1330_s18 = smov %s996_s19 }
 0x33d   : > { %s1331_s19 = smov %s1000_s20  ;;  %s1332_s20 = smov %s1077_s27 }
 0x33e   : > { %s1333_s21 = smov %s1066_s24  ;;  %17 = sbr.rel (!%p15_p2) target bundleno = 3 (0x3), region = 75 }
 0x343   :  { %780 = vsyncpa [#allocation3], 1 }
 0x344   :  { %782 = vsyncpa [#allocation3 + $0x1], 1 }

</bundles_post_ra>
